<compile_context>
chip_gen: v6e
topology: v6e:2x2x1
jax: 0.10.0
libtpu: 0.0.40
codegen_flags: <defaults>
</compile_context>

<pallas_src>
import functools
import math

import jax
import jax.numpy as jnp
from jax.experimental import pallas as pl
from jax.experimental.pallas import tpu as pltpu


# ----------------------------------------------------------------------------
# Fused kernel: H-tiled MLP + all Matryoshka levels (normalize + 2-bit quantize)
#
# grid = (batch_tiles ["parallel"], hidden_tiles ["arbitrary" = reduction])
# ----------------------------------------------------------------------------
def _fused_kernel(dims, x_ref, w1_ref, b1_ref, w2_ref, b2_ref, thr_ref,
                  nq_ref, q_ref, acc_ref):
    k = pl.program_id(1)

    @pl.when(k == 0)
    def _init():
        acc_ref[...] = jnp.zeros_like(acc_ref)

    # --- MLP partial sum: acc += GELU(x @ W1[:, k-tile] + b1[k-tile]) @ W2[k-tile, :]
    h = jnp.dot(x_ref[...], w1_ref[...], preferred_element_type=jnp.float32) + b1_ref[...]
    # Exact (erf-based) GELU, matching torch.nn.GELU() default.  erf -> EUP slot.
    h = 0.5 * h * (1.0 + jax.lax.erf(h * (1.0 / math.sqrt(2.0))))
    acc_ref[...] += jnp.dot(h.astype(jnp.bfloat16), w2_ref[...],
                            preferred_element_type=jnp.float32)

    # --- Epilogue at the last H tile: y stays resident in VMEM, all levels fused.
    @pl.when(k == pl.num_programs(1) - 1)
    def _finalize():
        y = acc_ref[...] + b2_ref[...]                        # (TB, D) f32
        y2 = y * y
        TB, D = y.shape
        col = jax.lax.broadcasted_iota(jnp.int32, (1, D), 1)  # hoisted, reused per level
        thr = thr_ref[...]                                    # (L, 3, D), loaded once

        # Nested levels -> incremental prefix sum of squares: each level only
        # reduces its NEW feature segment (total XLU work O(D) instead of O(L*D)).
        ssq = jnp.zeros((TB, 1), jnp.float32)
        prev_d = 0
        for l, d in enumerate(dims):                          # static unroll over levels
            seg = (col >= prev_d) & (col < d)
            ssq = ssq + jnp.sum(jnp.where(seg, y2, 0.0), axis=1, keepdims=True)
            mask = col < d                                    # prefix mask for this level
            # F.normalize(p=2, eps=1e-12): denom = max(||y||,1e-12) == rsqrt(max(ssq,1e-24))
            inv = jax.lax.rsqrt(jnp.maximum(ssq, 1e-24))      # EUP, ~free slot
            yn = jnp.where(mask, y * inv, 0.0)
            nq_ref[l, :, :] = yn.astype(nq_ref.dtype)

            # 4-level threshold quantization (thresholds pre-sorted ascending):
            #   level 0: x <= t0 ; 1: t0 < x <= t1 ; 2: t1 < x <= t2 ; 3: x > t2
            t0 = thr[l, 0:1, :]
            t1 = thr[l, 1:2, :]
            t2 = thr[l, 2:3, :]
            q = jnp.where(yn <= t0, 0.0,
                jnp.where(yn <= t1, 1.0,
                jnp.where(yn <= t2, 2.0, 3.0)))
            q_ref[l, :, :] = jnp.where(mask, q, 0.0).astype(q_ref.dtype)
            prev_d = d
            # TODO(synk): could emit q as int8 codes (4x less writeback) if the
            # caller accepts integer codes instead of float levels.


# ----------------------------------------------------------------------------
# Wrapper: padding, tiling, BlockSpecs, and per-level un-packing
# ----------------------------------------------------------------------------
def matryoshka_forward(x, params, dimension_levels, thresholds,
                       *, batch_tile=8, hidden_tile=512):
    w1, b1, w2, b2 = params
    B, D = x.shape
    H = w1.shape[1]
    L = len(dimension_levels)
    assert list(dimension_levels) == sorted(dimension_levels)
    assert dimension_levels[-1] == D, "largest dimension level must equal input_dim"

    # Pad batch to a multiple of the (>=8 row) batch tile so sublanes aren't wasted
    # and stores are unmasked; padded rows are sliced off afterwards.
    TB = batch_tile
    Bp = ((B + TB - 1) // TB) * TB
    x_p = x if Bp == B else jnp.concatenate(
        [x, jnp.zeros((Bp - B, D), x.dtype)], axis=0)
    x_p = x_p.astype(jnp.bfloat16)          # half the activation DMA, no in-kernel cast

    # Hidden-dim tile: largest power-of-two multiple of 128 (<= hidden_tile) dividing H;
    # fall back to the whole H if none divides (single reduction step).
    TH = hidden_tile
    while TH >= 128 and H % TH:
        TH //= 2
    if TH < 128:
        TH = H
    grid = (Bp // TB, H // TH)

    flops = 4 * Bp * D * H                      # two matmuls
    bytes_accessed = (x_p.size * 2 + w1.size * 2 + w2.size * 2 +
                      b1.size * 4 + b2.size * 4 + thresholds.size * 4 +
                      2 * L * Bp * D * 4)

    nq_all, q_all = pl.pallas_call(
        functools.partial(_fused_kernel, tuple(int(d) for d in dimension_levels)),
        out_shape=(jax.ShapeDtypeStruct((L, Bp, D), jnp.float32),
                   jax.ShapeDtypeStruct((L, Bp, D), jnp.float32)),
        grid=grid,
        in_specs=[
            pl.BlockSpec((TB, D), lambda i, k: (i, 0)),       # x         (bf16)
            pl.BlockSpec((D, TH), lambda i, k: (0, k)),       # W1        (bf16)
            pl.BlockSpec((1, TH), lambda i, k: (0, k)),       # b1        (f32)
            pl.BlockSpec((TH, D), lambda i, k: (k, 0)),       # W2        (bf16)
            pl.BlockSpec((1, D), lambda i, k: (0, 0)),        # b2        (f32)
            pl.BlockSpec((L, 3, D), lambda i, k: (0, 0, 0)),  # thresholds
        ],
        out_specs=(pl.BlockSpec((L, TB, D), lambda i, k: (0, i, 0)),   # non-quant slab
                   pl.BlockSpec((L, TB, D), lambda i, k: (0, i, 0))),  # quantized slab
        scratch_shapes=[pltpu.VMEM((TB, D), jnp.float32)],             # y accumulator
        compiler_params=pltpu.CompilerParams(
            dimension_semantics=("parallel", "arbitrary"),
            vmem_limit_bytes=64 * 1024 * 1024),
        cost_estimate=pl.CostEstimate(flops=flops,
                                      transcendentals=Bp * H,
                                      bytes_accessed=bytes_accessed),
    )(x_p, w1, b1, w2, b2, thresholds)

    embeddings = {}
    non_quant_embeddings = {}
    for l, d in enumerate(dimension_levels):
        non_quant_embeddings[d] = nq_all[l, :B, :d]
        embeddings[d] = q_all[l, :B, :d]
    return embeddings, non_quant_embeddings


# ----------------------------------------------------------------------------
# Parameter construction (deterministic, mirrors __init__ shapes & inits)
# ----------------------------------------------------------------------------
def make_params(key, input_dim):
    hidden = input_dim * 32
    k1, k2 = jax.random.split(key)
    # kaiming_normal_ (fan_in, gain=sqrt(2)) on PyTorch (out,in) weights; stored (in,out),
    # cast to bf16 for full-rate MXU matmuls (accumulation stays f32 in-kernel).
    w1 = (jax.random.normal(k1, (input_dim, hidden), jnp.float32)
          * math.sqrt(2.0 / input_dim)).astype(jnp.bfloat16)
    w2 = (jax.random.normal(k2, (hidden, input_dim), jnp.float32)
          * math.sqrt(2.0 / hidden)).astype(jnp.bfloat16)
    b1 = jnp.zeros((1, hidden), jnp.float32)
    b2 = jnp.zeros((1, input_dim), jnp.float32)
    return w1, b1, w2, b2


def make_thresholds(dimension_levels, input_dim):
    # QuantizationLayer registers thresholds as zeros(dim, num_thresholds=3).
    # Kernel expects one packed array (L, 3, input_dim): per-level sorted thresholds
    # in the first d lanes (remaining lanes unused / masked).
    L = len(dimension_levels)
    out = jnp.zeros((L, 3, input_dim), jnp.float32)
    for l, d in enumerate(dimension_levels):
        t = jnp.zeros((d, 3), jnp.float32)          # buffer init (zeros)
        t_sorted = jnp.sort(t, axis=1).T            # (3, d), matches torch.sort(dim=1)
        out = out.at[l, :, :d].set(t_sorted)
    return out


if __name__ == "__main__":
    input_dim = 32
    dimension_levels = [8, 16, 32]                  # sorted, last == input_dim
    batch = 2

    key = jax.random.PRNGKey(0)
    kx, kp = jax.random.split(key)
    x = jax.random.normal(kx, (batch, input_dim), jnp.float32)

    params = make_params(kp, input_dim)
    thresholds = make_thresholds(dimension_levels, input_dim)

    embeddings, non_quant = matryoshka_forward(x, params, dimension_levels, thresholds)
    jax.block_until_ready(embeddings)
    jax.block_until_ready(non_quant)

    # Sanity checks against a pure-JAX reference (same bf16 operand / f32 accumulate path).
    w1, b1, w2, b2 = params
    h_ref = jnp.dot(x.astype(jnp.bfloat16), w1, preferred_element_type=jnp.float32) + b1
    h_ref = 0.5 * h_ref * (1.0 + jax.lax.erf(h_ref / math.sqrt(2.0)))
    y_ref = jnp.dot(h_ref.astype(jnp.bfloat16), w2, preferred_element_type=jnp.float32) + b2
    for d in dimension_levels:
        yd = y_ref[:, :d]
        nrm = jnp.maximum(jnp.linalg.norm(yd, axis=1, keepdims=True), 1e-12)
        nq_ref = yd / nrm
        assert non_quant[d].shape == (batch, d)
        assert embeddings[d].shape == (batch, d)
        assert jnp.allclose(non_quant[d], nq_ref, atol=2e-3), d
        # zero thresholds -> levels {0, 3}; exact w.r.t. the kernel's own normalized output
        q_expect = jnp.where(non_quant[d] > 0.0, 3.0, 0.0)
        assert jnp.array_equal(embeddings[d], q_expect), d

    print("KERNEL_OK")
</pallas_src>

<mosaic_0001>
module attributes {stable_mosaic.version = 11 : i64} {
  func.func @_fused_kernel(%arg0: i32, %arg1: i32, %arg2: memref<8x32xbf16, #tpu.memory_space<vmem>>, %arg3: memref<32x512xbf16, #tpu.memory_space<vmem>>, %arg4: memref<1x512xf32, #tpu.memory_space<vmem>>, %arg5: memref<512x32xbf16, #tpu.memory_space<vmem>>, %arg6: memref<1x32xf32, #tpu.memory_space<vmem>>, %arg7: memref<3x3x32xf32, #tpu.memory_space<vmem>>, %arg8: memref<3x8x32xf32, #tpu.memory_space<vmem>>, %arg9: memref<3x8x32xf32, #tpu.memory_space<vmem>>, %arg10: memref<8x32xf32, #tpu.memory_space<vmem>>) attributes {dimension_semantics = [#tpu.dimension_semantics<parallel>, #tpu.dimension_semantics<arbitrary>], iteration_bounds = array<i64: 1, 2>, scalar_prefetch = 0 : i64, scratch_operands = 1 : i64, tpu.core_type = #tpu.core_type<tc>, window_params = [{transform_indices = @transform_0, window_bounds = array<i64: 8, 32>}, {transform_indices = @transform_1, window_bounds = array<i64: 32, 512>}, {transform_indices = @transform_2, window_bounds = array<i64: 1, 512>}, {transform_indices = @transform_3, window_bounds = array<i64: 512, 32>}, {pipeline_mode = #tpu.pipeline_mode<synchronous>, transform_indices = @transform_4, window_bounds = array<i64: 1, 32>}, {pipeline_mode = #tpu.pipeline_mode<synchronous>, transform_indices = @transform_5, window_bounds = array<i64: 3, 3, 32>}, {transform_indices = @transform_6, window_bounds = array<i64: 3, 8, 32>}, {transform_indices = @transform_7, window_bounds = array<i64: 3, 8, 32>}]} {
    %c0_i32 = arith.constant 0 : i32
    %0 = arith.cmpi eq, %arg1, %c0_i32 : i32
    %1 = arith.extui %0 : i1 to i32
    %c0_i32_0 = arith.constant 0 : i32
    %2 = arith.cmpi ne, %1, %c0_i32_0 : i32
    scf.if %2 {
      %cst_17 = arith.constant 0.000000e+00 : f32
      %26 = vector.broadcast %cst_17 : f32 to vector<8x32xf32>
      %c0_18 = arith.constant 0 : index
      %c0_19 = arith.constant 0 : index
      %27 = vector.load %arg10[%c0_18, %c0_19] : memref<8x32xf32, #tpu.memory_space<vmem>>, vector<8x32xf32>
      tpu.vector_store %arg10[%c0_18, %c0_19], %26 {strides = array<i32>} : memref<8x32xf32, #tpu.memory_space<vmem>>, vector<8x32xf32>,
    } else {
    }
    %c0 = arith.constant 0 : index
    %c0_1 = arith.constant 0 : index
    %3 = vector.load %arg2[%c0, %c0_1] : memref<8x32xbf16, #tpu.memory_space<vmem>>, vector<8x32xbf16>
    %c0_2 = arith.constant 0 : index
    %c0_3 = arith.constant 0 : index
    %4 = vector.load %arg3[%c0_2, %c0_3] : memref<32x512xbf16, #tpu.memory_space<vmem>>, vector<32x512xbf16>
    %cst = arith.constant dense<0.000000e+00> : vector<8x512xf32>
    %5 = tpu.matmul %3, %4, %cst {dimension_numbers = #tpu.dot_dimension_numbers<[1], [0], [0], [1], [0, 0, 1, 1], [], []>} : vector<8x32xbf16>, vector<32x512xbf16>, vector<8x512xf32> -> vector<8x512xf32>
    %c0_4 = arith.constant 0 : index
    %c0_5 = arith.constant 0 : index
    %6 = vector.load %arg4[%c0_4, %c0_5] : memref<1x512xf32, #tpu.memory_space<vmem>>, vector<1x512xf32>
    %7 = vector.broadcast %6 : vector<1x512xf32> to vector<8x512xf32>
    %8 = arith.addf %5, %7 : vector<8x512xf32>
    %cst_6 = arith.constant 5.000000e-01 : f32
    %9 = vector.broadcast %cst_6 : f32 to vector<8x512xf32>
    %10 = arith.mulf %9, %8 : vector<8x512xf32>
    %cst_7 = arith.constant 0.707106769 : f32
    %11 = vector.broadcast %cst_7 : f32 to vector<8x512xf32>
    %12 = arith.mulf %8, %11 : vector<8x512xf32>
    %13 = math.erf %12 : vector<8x512xf32>
    %cst_8 = arith.constant 1.000000e+00 : f32
    %14 = vector.broadcast %cst_8 : f32 to vector<8x512xf32>
    %15 = arith.addf %14, %13 : vector<8x512xf32>
    %16 = arith.mulf %10, %15 : vector<8x512xf32>
    %c0_9 = arith.constant 0 : index
    %c0_10 = arith.constant 0 : index
    %17 = vector.load %arg10[%c0_9, %c0_10] : memref<8x32xf32, #tpu.memory_space<vmem>>, vector<8x32xf32>
    %18 = arith.truncf %16 : vector<8x512xf32> to vector<8x512xbf16>
    %c0_11 = arith.constant 0 : index
    %c0_12 = arith.constant 0 : index
    %19 = vector.load %arg5[%c0_11, %c0_12] : memref<512x32xbf16, #tpu.memory_space<vmem>>, vector<512x32xbf16>
    %cst_13 = arith.constant dense<0.000000e+00> : vector<8x32xf32>
    %20 = tpu.matmul %18, %19, %cst_13 {dimension_numbers = #tpu.dot_dimension_numbers<[1], [0], [0], [1], [0, 0, 1, 1], [], []>} : vector<8x512xbf16>, vector<512x32xbf16>, vector<8x32xf32> -> vector<8x32xf32>
    %21 = arith.addf %17, %20 : vector<8x32xf32>
    %c0_14 = arith.constant 0 : index
    %c0_15 = arith.constant 0 : index
    %22 = vector.load %arg10[%c0_14, %c0_15] : memref<8x32xf32, #tpu.memory_space<vmem>>, vector<8x32xf32>
    tpu.vector_store %arg10[%c0_14, %c0_15], %21 {strides = array<i32>} : memref<8x32xf32, #tpu.memory_space<vmem>>, vector<8x32xf32>,
    %c1_i32 = arith.constant 1 : i32
    %23 = arith.cmpi eq, %arg1, %c1_i32 : i32
    %24 = arith.extui %23 : i1 to i32
    %c0_i32_16 = arith.constant 0 : i32
    %25 = arith.cmpi ne, %24, %c0_i32_16 : i32
    scf.if %25 {
      %c0_17 = arith.constant 0 : index
      %c0_18 = arith.constant 0 : index
      %26 = vector.load %arg10[%c0_17, %c0_18] : memref<8x32xf32, #tpu.memory_space<vmem>>, vector<8x32xf32>
      %c0_19 = arith.constant 0 : index
      %c0_20 = arith.constant 0 : index
      %27 = vector.load %arg6[%c0_19, %c0_20] : memref<1x32xf32, #tpu.memory_space<vmem>>, vector<1x32xf32>
      %28 = vector.broadcast %27 : vector<1x32xf32> to vector<8x32xf32>
      %29 = arith.addf %26, %28 : vector<8x32xf32>
      %30 = arith.mulf %29, %29 : vector<8x32xf32>
      %31 = tpu.iota {dimensions = array<i32: 1>} : vector<1x32xi32>
      %c0_21 = arith.constant 0 : index
      %c0_22 = arith.constant 0 : index
      %c0_23 = arith.constant 0 : index
      %32 = vector.load %arg7[%c0_21, %c0_22, %c0_23] : memref<3x3x32xf32, #tpu.memory_space<vmem>>, vector<3x3x32xf32>
      %cst_24 = arith.constant 0.000000e+00 : f32
      %33 = vector.broadcast %cst_24 : f32 to vector<8x1xf32>
      %c0_i32_25 = arith.constant 0 : i32
      %34 = vector.broadcast %c0_i32_25 : i32 to vector<1x32xi32>
      %35 = arith.cmpi sge, %31, %34 : vector<1x32xi32>
      %c8_i32 = arith.constant 8 : i32
      %36 = vector.broadcast %c8_i32 : i32 to vector<1x32xi32>
      %37 = arith.cmpi slt, %31, %36 : vector<1x32xi32>
      %38 = arith.andi %35, %37 : vector<1x32xi1>
      %cst_26 = arith.constant 0.000000e+00 : f32
      %39 = vector.shape_cast %38 : vector<1x32xi1> to vector<1x32xi1>
      %40 = vector.broadcast %39 : vector<1x32xi1> to vector<8x32xi1>
      %41 = vector.broadcast %cst_26 : f32 to vector<8x32xf32>
      %42 = arith.select %40, %30, %41 : vector<8x32xi1>, vector<8x32xf32>
      %cst_27 = arith.constant dense<0.000000e+00> : vector<8xf32>
      %43 = vector.multi_reduction <add>, %42, %cst_27 [1] : vector<8x32xf32> to vector<8xf32>
      %44 = vector.shape_cast %43 : vector<8xf32> to vector<8x1xf32>
      %45 = arith.addf %33, %44 : vector<8x1xf32>
      %c8_i32_28 = arith.constant 8 : i32
      %46 = vector.broadcast %c8_i32_28 : i32 to vector<1x32xi32>
      %47 = arith.cmpi slt, %31, %46 : vector<1x32xi32>
      %cst_29 = arith.constant 1.000000e-24 : f32
      %48 = vector.broadcast %cst_29 : f32 to vector<8x1xf32>
      %49 = arith.maximumf %45, %48 : vector<8x1xf32>
      %50 = math.rsqrt %49 : vector<8x1xf32>
      %51 = vector.broadcast %50 : vector<8x1xf32> to vector<8x32xf32>
      %52 = arith.mulf %29, %51 : vector<8x32xf32>
      %cst_30 = arith.constant 0.000000e+00 : f32
      %53 = vector.shape_cast %47 : vector<1x32xi1> to vector<1x32xi1>
      %54 = vector.broadcast %53 : vector<1x32xi1> to vector<8x32xi1>
      %55 = vector.broadcast %cst_30 : f32 to vector<8x32xf32>
      %56 = arith.select %54, %52, %55 : vector<8x32xi1>, vector<8x32xf32>
      %c0_31 = arith.constant 0 : index
      %c0_32 = arith.constant 0 : index
      %c0_33 = arith.constant 0 : index
      %57 = vector.load %arg8[%c0_31, %c0_32, %c0_33] : memref<3x8x32xf32, #tpu.memory_space<vmem>>, vector<1x8x32xf32>
      %58 = vector.shape_cast %57 : vector<1x8x32xf32> to vector<8x32xf32>
      %59 = vector.shape_cast %56 : vector<8x32xf32> to vector<1x8x32xf32>
      tpu.vector_store %arg8[%c0_31, %c0_32, %c0_33], %59 {strides = array<i32>} : memref<3x8x32xf32, #tpu.memory_space<vmem>>, vector<1x8x32xf32>,
      %60 = vector.extract_strided_slice %32 {offsets = [0, 0, 0], sizes = [1, 1, 32], strides = [1, 1, 1]} : vector<3x3x32xf32> to vector<1x1x32xf32>
      %61 = vector.shape_cast %60 : vector<1x1x32xf32> to vector<1x32xf32>
      %62 = vector.extract_strided_slice %32 {offsets = [0, 1, 0], sizes = [1, 1, 32], strides = [1, 1, 1]} : vector<3x3x32xf32> to vector<1x1x32xf32>
      %63 = vector.shape_cast %62 : vector<1x1x32xf32> to vector<1x32xf32>
      %64 = vector.extract_strided_slice %32 {offsets = [0, 2, 0], sizes = [1, 1, 32], strides = [1, 1, 1]} : vector<3x3x32xf32> to vector<1x1x32xf32>
      %65 = vector.shape_cast %64 : vector<1x1x32xf32> to vector<1x32xf32>
      %66 = vector.broadcast %61 : vector<1x32xf32> to vector<8x32xf32>
      %67 = arith.cmpf ole, %56, %66 : vector<8x32xf32>
      %68 = vector.broadcast %63 : vector<1x32xf32> to vector<8x32xf32>
      %69 = arith.cmpf ole, %56, %68 : vector<8x32xf32>
      %70 = vector.broadcast %65 : vector<1x32xf32> to vector<8x32xf32>
      %71 = arith.cmpf ole, %56, %70 : vector<8x32xf32>
      %cst_34 = arith.constant 2.000000e+00 : f32
      %cst_35 = arith.constant 3.000000e+00 : f32
      %72 = vector.broadcast %cst_34 : f32 to vector<8x32xf32>
      %73 = vector.broadcast %cst_35 : f32 to vector<8x32xf32>
      %74 = arith.select %71, %72, %73 : vector<8x32xi1>, vector<8x32xf32>
      %cst_36 = arith.constant 1.000000e+00 : f32
      %75 = vector.broadcast %cst_36 : f32 to vector<8x32xf32>
      %76 = arith.select %69, %75, %74 : vector<8x32xi1>, vector<8x32xf32>
      %cst_37 = arith.constant 0.000000e+00 : f32
      %77 = vector.broadcast %cst_37 : f32 to vector<8x32xf32>
      %78 = arith.select %67, %77, %76 : vector<8x32xi1>, vector<8x32xf32>
      %cst_38 = arith.constant 0.000000e+00 : f32
      %79 = vector.shape_cast %47 : vector<1x32xi1> to vector<1x32xi1>
      %80 = vector.broadcast %79 : vector<1x32xi1> to vector<8x32xi1>
      %81 = vector.broadcast %cst_38 : f32 to vector<8x32xf32>
      %82 = arith.select %80, %78, %81 : vector<8x32xi1>, vector<8x32xf32>
      %c0_39 = arith.constant 0 : index
      %c0_40 = arith.constant 0 : index
      %c0_41 = arith.constant 0 : index
      %83 = vector.load %arg9[%c0_39, %c0_40, %c0_41] : memref<3x8x32xf32, #tpu.memory_space<vmem>>, vector<1x8x32xf32>
      %84 = vector.shape_cast %83 : vector<1x8x32xf32> to vector<8x32xf32>
      %85 = vector.shape_cast %82 : vector<8x32xf32> to vector<1x8x32xf32>
      tpu.vector_store %arg9[%c0_39, %c0_40, %c0_41], %85 {strides = array<i32>} : memref<3x8x32xf32, #tpu.memory_space<vmem>>, vector<1x8x32xf32>,
      %c8_i32_42 = arith.constant 8 : i32
      %86 = vector.broadcast %c8_i32_42 : i32 to vector<1x32xi32>
      %87 = arith.cmpi sge, %31, %86 : vector<1x32xi32>
      %c16_i32 = arith.constant 16 : i32
      %88 = vector.broadcast %c16_i32 : i32 to vector<1x32xi32>
      %89 = arith.cmpi slt, %31, %88 : vector<1x32xi32>
      %90 = arith.andi %87, %89 : vector<1x32xi1>
      %cst_43 = arith.constant 0.000000e+00 : f32
      %91 = vector.shape_cast %90 : vector<1x32xi1> to vector<1x32xi1>
      %92 = vector.broadcast %91 : vector<1x32xi1> to vector<8x32xi1>
      %93 = vector.broadcast %cst_43 : f32 to vector<8x32xf32>
      %94 = arith.select %92, %30, %93 : vector<8x32xi1>, vector<8x32xf32>
      %cst_44 = arith.constant dense<0.000000e+00> : vector<8xf32>
      %95 = vector.multi_reduction <add>, %94, %cst_44 [1] : vector<8x32xf32> to vector<8xf32>
      %96 = vector.shape_cast %95 : vector<8xf32> to vector<8x1xf32>
      %97 = arith.addf %45, %96 : vector<8x1xf32>
      %c16_i32_45 = arith.constant 16 : i32
      %98 = vector.broadcast %c16_i32_45 : i32 to vector<1x32xi32>
      %99 = arith.cmpi slt, %31, %98 : vector<1x32xi32>
      %cst_46 = arith.constant 1.000000e-24 : f32
      %100 = vector.broadcast %cst_46 : f32 to vector<8x1xf32>
      %101 = arith.maximumf %97, %100 : vector<8x1xf32>
      %102 = math.rsqrt %101 : vector<8x1xf32>
      %103 = vector.broadcast %102 : vector<8x1xf32> to vector<8x32xf32>
      %104 = arith.mulf %29, %103 : vector<8x32xf32>
      %cst_47 = arith.constant 0.000000e+00 : f32
      %105 = vector.shape_cast %99 : vector<1x32xi1> to vector<1x32xi1>
      %106 = vector.broadcast %105 : vector<1x32xi1> to vector<8x32xi1>
      %107 = vector.broadcast %cst_47 : f32 to vector<8x32xf32>
      %108 = arith.select %106, %104, %107 : vector<8x32xi1>, vector<8x32xf32>
      %c1 = arith.constant 1 : index
      %c0_48 = arith.constant 0 : index
      %c0_49 = arith.constant 0 : index
      %109 = vector.load %arg8[%c1, %c0_48, %c0_49] : memref<3x8x32xf32, #tpu.memory_space<vmem>>, vector<1x8x32xf32>
      %110 = vector.shape_cast %109 : vector<1x8x32xf32> to vector<8x32xf32>
      %111 = vector.shape_cast %108 : vector<8x32xf32> to vector<1x8x32xf32>
      tpu.vector_store %arg8[%c1, %c0_48, %c0_49], %111 {strides = array<i32>} : memref<3x8x32xf32, #tpu.memory_space<vmem>>, vector<1x8x32xf32>,
      %112 = vector.extract_strided_slice %32 {offsets = [1, 0, 0], sizes = [1, 1, 32], strides = [1, 1, 1]} : vector<3x3x32xf32> to vector<1x1x32xf32>
      %113 = vector.shape_cast %112 : vector<1x1x32xf32> to vector<1x32xf32>
      %114 = vector.extract_strided_slice %32 {offsets = [1, 1, 0], sizes = [1, 1, 32], strides = [1, 1, 1]} : vector<3x3x32xf32> to vector<1x1x32xf32>
      %115 = vector.shape_cast %114 : vector<1x1x32xf32> to vector<1x32xf32>
      %116 = vector.extract_strided_slice %32 {offsets = [1, 2, 0], sizes = [1, 1, 32], strides = [1, 1, 1]} : vector<3x3x32xf32> to vector<1x1x32xf32>
      %117 = vector.shape_cast %116 : vector<1x1x32xf32> to vector<1x32xf32>
      %118 = vector.broadcast %113 : vector<1x32xf32> to vector<8x32xf32>
      %119 = arith.cmpf ole, %108, %118 : vector<8x32xf32>
      %120 = vector.broadcast %115 : vector<1x32xf32> to vector<8x32xf32>
      %121 = arith.cmpf ole, %108, %120 : vector<8x32xf32>
      %122 = vector.broadcast %117 : vector<1x32xf32> to vector<8x32xf32>
      %123 = arith.cmpf ole, %108, %122 : vector<8x32xf32>
      %cst_50 = arith.constant 2.000000e+00 : f32
      %cst_51 = arith.constant 3.000000e+00 : f32
      %124 = vector.broadcast %cst_50 : f32 to vector<8x32xf32>
      %125 = vector.broadcast %cst_51 : f32 to vector<8x32xf32>
      %126 = arith.select %123, %124, %125 : vector<8x32xi1>, vector<8x32xf32>
      %cst_52 = arith.constant 1.000000e+00 : f32
      %127 = vector.broadcast %cst_52 : f32 to vector<8x32xf32>
      %128 = arith.select %121, %127, %126 : vector<8x32xi1>, vector<8x32xf32>
      %cst_53 = arith.constant 0.000000e+00 : f32
      %129 = vector.broadcast %cst_53 : f32 to vector<8x32xf32>
      %130 = arith.select %119, %129, %128 : vector<8x32xi1>, vector<8x32xf32>
      %cst_54 = arith.constant 0.000000e+00 : f32
      %131 = vector.shape_cast %99 : vector<1x32xi1> to vector<1x32xi1>
      %132 = vector.broadcast %131 : vector<1x32xi1> to vector<8x32xi1>
      %133 = vector.broadcast %cst_54 : f32 to vector<8x32xf32>
      %134 = arith.select %132, %130, %133 : vector<8x32xi1>, vector<8x32xf32>
      %c1_55 = arith.constant 1 : index
      %c0_56 = arith.constant 0 : index
      %c0_57 = arith.constant 0 : index
      %135 = vector.load %arg9[%c1_55, %c0_56, %c0_57] : memref<3x8x32xf32, #tpu.memory_space<vmem>>, vector<1x8x32xf32>
      %136 = vector.shape_cast %135 : vector<1x8x32xf32> to vector<8x32xf32>
      %137 = vector.shape_cast %134 : vector<8x32xf32> to vector<1x8x32xf32>
      tpu.vector_store %arg9[%c1_55, %c0_56, %c0_57], %137 {strides = array<i32>} : memref<3x8x32xf32, #tpu.memory_space<vmem>>, vector<1x8x32xf32>,
      %c16_i32_58 = arith.constant 16 : i32
      %138 = vector.broadcast %c16_i32_58 : i32 to vector<1x32xi32>
      %139 = arith.cmpi sge, %31, %138 : vector<1x32xi32>
      %c32_i32 = arith.constant 32 : i32
      %140 = vector.broadcast %c32_i32 : i32 to vector<1x32xi32>
      %141 = arith.cmpi slt, %31, %140 : vector<1x32xi32>
      %142 = arith.andi %139, %141 : vector<1x32xi1>
      %cst_59 = arith.constant 0.000000e+00 : f32
      %143 = vector.shape_cast %142 : vector<1x32xi1> to vector<1x32xi1>
      %144 = vector.broadcast %143 : vector<1x32xi1> to vector<8x32xi1>
      %145 = vector.broadcast %cst_59 : f32 to vector<8x32xf32>
      %146 = arith.select %144, %30, %145 : vector<8x32xi1>, vector<8x32xf32>
      %cst_60 = arith.constant dense<0.000000e+00> : vector<8xf32>
      %147 = vector.multi_reduction <add>, %146, %cst_60 [1] : vector<8x32xf32> to vector<8xf32>
      %148 = vector.shape_cast %147 : vector<8xf32> to vector<8x1xf32>
      %149 = arith.addf %97, %148 : vector<8x1xf32>
      %c32_i32_61 = arith.constant 32 : i32
      %150 = vector.broadcast %c32_i32_61 : i32 to vector<1x32xi32>
      %151 = arith.cmpi slt, %31, %150 : vector<1x32xi32>
      %cst_62 = arith.constant 1.000000e-24 : f32
      %152 = vector.broadcast %cst_62 : f32 to vector<8x1xf32>
      %153 = arith.maximumf %149, %152 : vector<8x1xf32>
      %154 = math.rsqrt %153 : vector<8x1xf32>
      %155 = vector.broadcast %154 : vector<8x1xf32> to vector<8x32xf32>
      %156 = arith.mulf %29, %155 : vector<8x32xf32>
      %cst_63 = arith.constant 0.000000e+00 : f32
      %157 = vector.shape_cast %151 : vector<1x32xi1> to vector<1x32xi1>
      %158 = vector.broadcast %157 : vector<1x32xi1> to vector<8x32xi1>
      %159 = vector.broadcast %cst_63 : f32 to vector<8x32xf32>
      %160 = arith.select %158, %156, %159 : vector<8x32xi1>, vector<8x32xf32>
      %c2 = arith.constant 2 : index
      %c0_64 = arith.constant 0 : index
      %c0_65 = arith.constant 0 : index
      %161 = vector.load %arg8[%c2, %c0_64, %c0_65] : memref<3x8x32xf32, #tpu.memory_space<vmem>>, vector<1x8x32xf32>
      %162 = vector.shape_cast %161 : vector<1x8x32xf32> to vector<8x32xf32>
      %163 = vector.shape_cast %160 : vector<8x32xf32> to vector<1x8x32xf32>
      tpu.vector_store %arg8[%c2, %c0_64, %c0_65], %163 {strides = array<i32>} : memref<3x8x32xf32, #tpu.memory_space<vmem>>, vector<1x8x32xf32>,
      %164 = vector.extract_strided_slice %32 {offsets = [2, 0, 0], sizes = [1, 1, 32], strides = [1, 1, 1]} : vector<3x3x32xf32> to vector<1x1x32xf32>
      %165 = vector.shape_cast %164 : vector<1x1x32xf32> to vector<1x32xf32>
      %166 = vector.extract_strided_slice %32 {offsets = [2, 1, 0], sizes = [1, 1, 32], strides = [1, 1, 1]} : vector<3x3x32xf32> to vector<1x1x32xf32>
      %167 = vector.shape_cast %166 : vector<1x1x32xf32> to vector<1x32xf32>
      %168 = vector.extract_strided_slice %32 {offsets = [2, 2, 0], sizes = [1, 1, 32], strides = [1, 1, 1]} : vector<3x3x32xf32> to vector<1x1x32xf32>
      %169 = vector.shape_cast %168 : vector<1x1x32xf32> to vector<1x32xf32>
      %170 = vector.broadcast %165 : vector<1x32xf32> to vector<8x32xf32>
      %171 = arith.cmpf ole, %160, %170 : vector<8x32xf32>
      %172 = vector.broadcast %167 : vector<1x32xf32> to vector<8x32xf32>
      %173 = arith.cmpf ole, %160, %172 : vector<8x32xf32>
      %174 = vector.broadcast %169 : vector<1x32xf32> to vector<8x32xf32>
      %175 = arith.cmpf ole, %160, %174 : vector<8x32xf32>
      %cst_66 = arith.constant 2.000000e+00 : f32
      %cst_67 = arith.constant 3.000000e+00 : f32
      %176 = vector.broadcast %cst_66 : f32 to vector<8x32xf32>
      %177 = vector.broadcast %cst_67 : f32 to vector<8x32xf32>
      %178 = arith.select %175, %176, %177 : vector<8x32xi1>, vector<8x32xf32>
      %cst_68 = arith.constant 1.000000e+00 : f32
      %179 = vector.broadcast %cst_68 : f32 to vector<8x32xf32>
      %180 = arith.select %173, %179, %178 : vector<8x32xi1>, vector<8x32xf32>
      %cst_69 = arith.constant 0.000000e+00 : f32
      %181 = vector.broadcast %cst_69 : f32 to vector<8x32xf32>
      %182 = arith.select %171, %181, %180 : vector<8x32xi1>, vector<8x32xf32>
      %cst_70 = arith.constant 0.000000e+00 : f32
      %183 = vector.shape_cast %151 : vector<1x32xi1> to vector<1x32xi1>
      %184 = vector.broadcast %183 : vector<1x32xi1> to vector<8x32xi1>
      %185 = vector.broadcast %cst_70 : f32 to vector<8x32xf32>
      %186 = arith.select %184, %182, %185 : vector<8x32xi1>, vector<8x32xf32>
      %c2_71 = arith.constant 2 : index
      %c0_72 = arith.constant 0 : index
      %c0_73 = arith.constant 0 : index
      %187 = vector.load %arg9[%c2_71, %c0_72, %c0_73] : memref<3x8x32xf32, #tpu.memory_space<vmem>>, vector<1x8x32xf32>
      %188 = vector.shape_cast %187 : vector<1x8x32xf32> to vector<8x32xf32>
      %189 = vector.shape_cast %186 : vector<8x32xf32> to vector<1x8x32xf32>
      tpu.vector_store %arg9[%c2_71, %c0_72, %c0_73], %189 {strides = array<i32>} : memref<3x8x32xf32, #tpu.memory_space<vmem>>, vector<1x8x32xf32>,
    } else {
    }
    return
  }
  func.func @transform_0(%arg0: i32, %arg1: i32) -> (i32, i32) {
    %c0_i32 = arith.constant 0 : i32
    %c0_i32_0 = arith.constant 0 : i32
    return %arg0, %c0_i32 : i32, i32
  }
  func.func @transform_1(%arg0: i32, %arg1: i32) -> (i32, i32) {
    %c0_i32 = arith.constant 0 : i32
    %c0_i32_0 = arith.constant 0 : i32
    return %c0_i32, %arg1 : i32, i32
  }
  func.func @transform_2(%arg0: i32, %arg1: i32) -> (i32, i32) {
    %c0_i32 = arith.constant 0 : i32
    %c0_i32_0 = arith.constant 0 : i32
    return %c0_i32, %arg1 : i32, i32
  }
  func.func @transform_3(%arg0: i32, %arg1: i32) -> (i32, i32) {
    %c0_i32 = arith.constant 0 : i32
    %c0_i32_0 = arith.constant 0 : i32
    return %arg1, %c0_i32 : i32, i32
  }
  func.func @transform_4(%arg0: i32, %arg1: i32) -> (i32, i32) {
    %c0_i32 = arith.constant 0 : i32
    %c0_i32_0 = arith.constant 0 : i32
    %c0_i32_1 = arith.constant 0 : i32
    return %c0_i32, %c0_i32_0 : i32, i32
  }
  func.func @transform_5(%arg0: i32, %arg1: i32) -> (i32, i32, i32) {
    %c0_i32 = arith.constant 0 : i32
    %c0_i32_0 = arith.constant 0 : i32
    %c0_i32_1 = arith.constant 0 : i32
    %c0_i32_2 = arith.constant 0 : i32
    return %c0_i32, %c0_i32_0, %c0_i32_1 : i32, i32, i32
  }
  func.func @transform_6(%arg0: i32, %arg1: i32) -> (i32, i32, i32) {
    %c0_i32 = arith.constant 0 : i32
    %c0_i32_0 = arith.constant 0 : i32
    %c0_i32_1 = arith.constant 0 : i32
    return %c0_i32, %arg0, %c0_i32_0 : i32, i32, i32
  }
  func.func @transform_7(%arg0: i32, %arg1: i32) -> (i32, i32, i32) {
    %c0_i32 = arith.constant 0 : i32
    %c0_i32_0 = arith.constant 0 : i32
    %c0_i32_1 = arith.constant 0 : i32
    return %c0_i32, %arg0, %c0_i32_0 : i32, i32, i32
  }
}

</mosaic_0001>

<bundles_post_ra>
// kernel: tpu_custom_call.1
= control target key start
LH: loop header
LB: loop body
LE: loop exit
PB: predicated region body
PF: predicated region fallthrough
CT: control target
= control target key end

     0   :  { %13 = vsyncpa [#allocation5], 0  ;;  %s1753_s0 = inlined_call_operand.vmem [shape: bf16[8,32], index: 0, kind: input, shape index: {}]   ;;  %s1754_s1 = inlined_call_operand.vmem [shape: bf16[32,1024], index: 1, kind: input, shape index: {}]   ;;  %s1755_s2 = inlined_call_operand.vmem [shape: f32[1,1024], index: 2, kind: input, shape index: {}]   ;;  %s1756_s3 = inlined_call_operand.vmem [shape: bf16[1024,32], index: 3, kind: input, shape index: {}]   ;;  %s1757_s4 = inlined_call_operand.vmem [shape: f32[1,32], index: 4, kind: input, shape index: {}]   ;;  %s1758_s5 = inlined_call_operand.vmem [shape: f32[3,3,32], index: 5, kind: input, shape index: {}]   ;;  %s1759_s6 = inlined_call_operand.hbm [shape: f32[3,8,32], index: 6, kind: output, shape index: {0}]   ;;  %s1760_s7 = inlined_call_operand.hbm [shape: f32[3,8,32], index: 7, kind: output, shape index: {1}]  }
   0x1   :  { %14 = vsyncpa [#allocation7], 0  ;;  %s1539_s24 = smov 0   ;;  %s1541_s25 = smov 0  }
   0x2   :  { %s1543_s26 = smov 0   ;;  %s1545_s27 = smov 0  }
   0x3   :  { %s1547_s28 = smov 0  }
   0x4 LB: > { %s1171_s29 = sadd.s32 4294967295, %s1490_s28   ;;  %s29_s30 = sadd.s32 1, %s1486_s27  ;;  %s1490_s28 = sphi %s1547_s28, %s20_s28   ;;  %s1486_s27 = sphi %s1545_s27, %s1765_s27   ;;  %s1482_s26 = sphi %s1543_s26, %s1764_s26   ;;  %s1478_s25 = sphi %s1541_s25, %s1763_s25   ;;  %s1474_s24 = sphi %s1539_s24, %s1762_s24  }
   0x5   : > { %p30_p0 = scmp.ge.s32.totalorder %s29_s30, 2  ;;  %p72_p1 = scmp.ne.s32.totalorder %s1478_s25, %s1474_s24 }
   0x6   : > { %p73_p2 = scmp.eq.s32.totalorder %s1490_s28, 0  ;;  %s65_s9 = sadd.s32 1, %s1478_s25 }
   0x7   : > { %s1767_s30 = smov (%p30_p0, %s29_s30), 0  ;;  %p1174_p5 = scmp.ge.s32.totalorder %s1490_s28, 2 }
   0x8   : > { %p74_p3 = por %p73_p2, %p72_p1  ;;  %s62_s8 = ssub.s32 %s1486_s27, %s1767_s30 }
   0x9   : > { %p63_p4 = scmp.eq.s32.totalorder %s62_s8, 0  ;;  %257 = sbr.rel (%p1174_p5) target bundleno = 22 (0x16), region = 28 }
   0xb   : > { %s1575_s10 = scalar_select %p63_p4, %s1478_s25, %s65_s9  }
   0xe   : > { %260 = sbr.rel (!%p74_p3) target bundleno = 22 (0x16), region = 32  ;;  %s262_s11 = sand.u32 (%p74_p3), 1, %s1478_s25  }
   0xf   : > { %s1234_s12 = sshll.u32 (%p74_p3), %s1486_s27, 4  ;;  %s1175_s13 = sshll.u32 (%p74_p3), %s262_s11, 6 }
  0x10   : > { %s267_s16 = scalar_lea.vmem (%p74_p3), %s1754_s1, %s1234_s12  ;;  %s264_s17 = scalar_lea.vmem (%p74_p3), [#allocation3], %s1175_s13 }
  0x11   : > { %v280_v0 = vld [vmem:[%s267_s16] sm:$0xff] (%p74_p3)  ;;  %v282_v1 = vld [vmem:[%s267_s16 + $0x8] sm:$0xff] (%p74_p3) }
  0x12   : > { %v284_v2 = vld [vmem:[%s267_s16 + $0x20] sm:$0xff] (%p74_p3)  ;;  %281 = vst [vmem:[%s264_s17] sm:$0xff] (%p74_p3), %v280_v0  ;;  %283 = vst [vmem:[%s264_s17 + $0x8] sm:$0xff] (%p74_p3), %v282_v1  ;;  %v286_v3 = vld [vmem:[%s267_s16 + $0x28] sm:$0xff] (%p74_p3) }
  0x13   : > { %285 = vst [vmem:[%s264_s17 + $0x10] sm:$0xff] %v284_v2  ;;  %v288_v4 = vld [vmem:[%s267_s16 + $0x40] sm:$0xff]  ;;  %v290_v5 = vld [vmem:[%s267_s16 + $0x48] sm:$0xff]  ;;  %287 = vst [vmem:[%s264_s17 + $0x18] sm:$0xff] %v286_v3 }
  0x14   : > { %289 = vst [vmem:[%s264_s17 + $0x20] sm:$0xff] %v288_v4  ;;  %291 = vst [vmem:[%s264_s17 + $0x28] sm:$0xff] %v290_v5  ;;  %v292_v6 = vld [vmem:[%s267_s16 + $0x60] sm:$0xff]  ;;  %v294_v7 = vld [vmem:[%s267_s16 + $0x68] sm:$0xff] }
  0x15   : > { %293 = vst [vmem:[%s264_s17 + $0x30] sm:$0xff] %v292_v6  ;;  %295 = vst [vmem:[%s264_s17 + $0x38] sm:$0xff] %v294_v7 }
  0x16 PF: > { %p1178_p6 = scmp.ge.s32.totalorder %s1490_s28, 1  ;;  %p317_p7 = scmp.lt.s32.totalorder %s1490_s28, 3 }
  0x18   : > { %p318_p8 = pnand %p1178_p6, %p317_p7 }
  0x19   : > { %s324_s18 = sand.u32 (!%p318_p8), 1, %s1474_s24   ;;  %s1180_s19 = sshll.u32 (!%p318_p8), %s1482_s26, 2 }
  0x1a   : > { %321 = sbr.rel (%p318_p8) target bundleno = 688 (0x2b0), region = 63  ;;  %s1179_s20 = sshll.u32 (!%p318_p8), %s324_s18, 6 }
  0x1b   : > { %p369_p9 = scmp.lt.s32.totalorder (!%p318_p8), %s1180_s19, 7  ;;  %s1181_s21 = sshll.u32 (!%p318_p8), %s1482_s26, 6 }
  0x1c   : > { %p374_p10 = scmp.lt.s32.totalorder (!%p318_p8), %s1181_s21, 127  ;;  %s326_s24 = scalar_lea.vmem (!%p318_p8), [#allocation3], %s1179_s20 }
  0x1d   : > { %p1183_p11 = scmp.ne.s32.totalorder (!%p318_p8), %s1482_s26, 0 }
  0x1f   : > { %s1769_s19 = smov (!%p369_p9, %s1180_s19), 7  ;;  %s1771_s21 = smov (!%p374_p10, %s1181_s21), 127 }
  0x20   : > { %s371_s8 = scalar_lea.vmem %s1755_s2, %s1769_s19  ;;  %s1182_s9 = sshll.u32 %s1771_s21, 2 }
  0x21   : > { %s1597_s13 = scalar_lea.vmem %s1756_s3, %s1182_s9  ;;  %383 = sbr.rel (%p1183_p11) target bundleno = 40 (0x28), region = 71 }
  0x26   : > { %vm384_vm0 = vcmask 261120   ;;  %v1492_v8 = vmov 0.0  }
  0x27   : > { %385 = vst.msk [vmem:[#allocation2] sm:$0xff] %vm384_vm0, %v1492_v8 }
  0x28 PF: > { %v1338_v9 = vld [vmem:[%s326_s24 + $0x24] ss:$16 sps:$4 sm:$0xff]   ;;  %v1340_v10 = vld [vmem:[%s326_s24 + $0x2c] ss:$16 sps:$4 sm:$0xff]   ;;  %v1493_v11 = vmov 0   ;;  %vm457_vm1 = vcmask 261120   ;;  %v397_v51 = vlaneseq }
  0x29   : > { %493 = vmatprep.mubr.bf16.mxu0 %v1493_v11  ;;  %534 = vmatprep.mubr.bf16.mxu1 %v1493_v11  ;;  %v1342_v12 = vld [vmem:[%s326_s24 + $0x20] ss:$16 sps:$4 sm:$0xff]   ;;  %v1343_v13 = vld [vmem:[%s326_s24 + $0x28] ss:$16 sps:$4 sm:$0xff]   ;;  %v1344_v14 = vld [vmem:[%s326_s24 + $0x4] ss:$16 sps:$4 sm:$0xff]  }
  0x2a   : > { %473 = vmatprep.subr.bf16.mxu0 %v1338_v9  ;;  %514 = vmatprep.subr.bf16.mxu1 %v1340_v10  ;;  %v1346_v15 = vld [vmem:[%s326_s24 + $0xc] ss:$16 sps:$4 sm:$0xff]   ;;  %v1348_v16 = vld [vmem:[%s326_s24] ss:$16 sps:$4 sm:$0xff]   ;;  %v1349_v17 = vld [vmem:[%s326_s24 + $0x8] ss:$16 sps:$4 sm:$0xff]  }
  0x2b   : > { %474 = vmatpush1.bf16.msra.mxu0 %v1342_v12  ;;  %515 = vmatpush1.bf16.msra.mxu1 %v1343_v13  ;;  %v386_v18 = vld [vmem:[%s1753_s0] sm:$0xf]  ;;  %v1350_v19 = vld [vmem:[%s1597_s13 + $0x78] sm:$0xff]   ;;  %v1354_v23 = vld [vmem:[%s1597_s13 + $0x70] sm:$0xff]   ;;  %v398_v52 = vshrl.u32 %v397_v51, 7  ;;  %p1226_p12 = scmp.ne.s32.totalorder %s1482_s26, 1 }
  0x2c   : > { %475 = vmatprep.subr.bf16.mxu0 %v1344_v14  ;;  %516 = vmatprep.subr.bf16.mxu1 %v1346_v15  ;;  %v1351_v20 = vld [vmem:[%s1597_s13 + $0xf8] sm:$0xff]   ;;  %v1355_v24 = vld [vmem:[%s1597_s13 + $0xf0] sm:$0xff]   ;;  %v1358_v27 = vld [vmem:[%s1597_s13 + $0x68] sm:$0xff]  }
  0x2d   : > { %v1352_v21 = vld [vmem:[%s1597_s13 + $0x38] sm:$0xff]   ;;  %v1356_v25 = vld [vmem:[%s1597_s13 + $0x30] sm:$0xff]   ;;  %v1359_v28 = vld [vmem:[%s1597_s13 + $0xe8] sm:$0xff]   ;;  %v1638_v53 = vsub.s32 0, %v398_v52  ;;  %v1640_v54 = vsub.s32 2, %v398_v52  ;;  %v1647_v56 = vsub.s32 1, %v398_v52 }
  0x2e   : > { %v1353_v22 = vld [vmem:[%s1597_s13 + $0xb8] sm:$0xff]   ;;  %v1357_v26 = vld [vmem:[%s1597_s13 + $0xb0] sm:$0xff]   ;;  %v1360_v29 = vld [vmem:[%s1597_s13 + $0x28] sm:$0xff]   ;;  %v411_v57 = vsub.s32 3, %v398_v52 }
  0x2f   : > { %476 = vmatpush1.bf16.msra.mxu0 %v1348_v16  ;;  %517 = vmatpush1.bf16.msra.mxu1 %v1349_v17  ;;  %v1361_v30 = vld [vmem:[%s1597_s13 + $0xa8] sm:$0xff]   ;;  %v1362_v31 = vld [vmem:[%s1597_s13 + $0x60] sm:$0xff]   ;;  %v1366_v35 = vld [vmem:[%s1597_s13 + $0x58] sm:$0xff]  }
  0x30   : > { %1235 = vmatprep.subr.bf16.mxu0 %v1350_v19  ;;  %1257 = vmatprep.subr.bf16.mxu1 %v1351_v20  ;;  %v1363_v32 = vld [vmem:[%s1597_s13 + $0xe0] sm:$0xff]   ;;  %v1367_v36 = vld [vmem:[%s1597_s13 + $0xd8] sm:$0xff]   ;;  %v1370_v39 = vld [vmem:[%s1597_s13 + $0x50] sm:$0xff]  }
  0x31   : > { %v1364_v33 = vld [vmem:[%s1597_s13 + $0x20] sm:$0xff]   ;;  %v1368_v37 = vld [vmem:[%s1597_s13 + $0x18] sm:$0xff]   ;;  %v1371_v40 = vld [vmem:[%s1597_s13 + $0xd0] sm:$0xff]  }
  0x32   : > { %1192 = vmatmul.mubr.msk.bf16.vlgmr.msra.gmra.mxu0 %vm457_vm1, %v386_v18  ;;  %1193 = vmatmul.mubr.msk.bf16.vlgmr.msra.gmra.mxu1 %vm457_vm1, %v386_v18  ;;  %v1365_v34 = vld [vmem:[%s1597_s13 + $0xa0] sm:$0xff]   ;;  %v1369_v38 = vld [vmem:[%s1597_s13 + $0x98] sm:$0xff]   ;;  %v1372_v41 = vld [vmem:[%s1597_s13 + $0x10] sm:$0xff]  }
  0x33   : > { %1236 = vmatpush3.bf16.msra.mxu0 %v1352_v21  ;;  %1258 = vmatpush3.bf16.msra.mxu1 %v1353_v22  ;;  %v1373_v42 = vld [vmem:[%s1597_s13 + $0x90] sm:$0xff]   ;;  %v1374_v43 = vld [vmem:[%s1597_s13 + $0x48] sm:$0xff]   ;;  %v1378_v47 = vld [vmem:[%s1597_s13 + $0x40] sm:$0xff]  }
  0x34   : > { %1237 = vmatprep.subr.bf16.mxu0 %v1354_v23  ;;  %1259 = vmatprep.subr.bf16.mxu1 %v1355_v24  ;;  %v1375_v44 = vld [vmem:[%s1597_s13 + $0xc8] sm:$0xff]   ;;  %v1379_v48 = vld [vmem:[%s1597_s13 + $0xc0] sm:$0xff]  }
  0x35   : > { %v1376_v45 = vld [vmem:[%s1597_s13 + $0x8] sm:$0xff]   ;;  %v1380_v49 = vld [vmem:[%s1597_s13] sm:$0xff]  }
  0x36   : > { %v1377_v46 = vld [vmem:[%s1597_s13 + $0x88] sm:$0xff]   ;;  %v1381_v50 = vld [vmem:[%s1597_s13 + $0x80] sm:$0xff]  }
  0x37   : > { %1238 = vmatpush3.bf16.msra.mxu0 %v1356_v25  ;;  %1260 = vmatpush3.bf16.msra.mxu1 %v1357_v26  ;;  %v395_v55 = vld [vmem:[%s371_s8] sm:$0xf] }
  0x38   : > { %1239 = vmatprep.subr.bf16.mxu0 %v1358_v27  ;;  %1261 = vmatprep.subr.bf16.mxu1 %v1359_v28  ;;  %v400_v58 = vrot.slane %v395_v55, %v1638_v53  ;;  %v408_v59 = vrot.slane %v395_v55, %v1640_v54  ;;  %v404_v62 = vrot.slane %v395_v55, %v1647_v56 }
  0x39   : > { %v412_v63 = vrot.slane %v395_v55, %v411_v57 }
  0x3b   : > { %1240 = vmatpush3.bf16.msra.mxu0 %v1360_v29  ;;  %1262 = vmatpush3.bf16.msra.mxu1 %v1361_v30 }
  0x3c   : > { %1241 = vmatprep.subr.bf16.mxu0 %v1362_v31  ;;  %1263 = vmatprep.subr.bf16.mxu1 %v1363_v32 }
  0x3f   : > { %1242 = vmatpush3.bf16.msra.mxu0 %v1364_v33  ;;  %1264 = vmatpush3.bf16.msra.mxu1 %v1365_v34 }
  0x40   : > { %1243 = vmatprep.subr.bf16.mxu0 %v1366_v35  ;;  %1265 = vmatprep.subr.bf16.mxu1 %v1367_v36 }
  0x43   : > { %1244 = vmatpush3.bf16.msra.mxu0 %v1368_v37  ;;  %1266 = vmatpush3.bf16.msra.mxu1 %v1369_v38 }
  0x44   : > { %1245 = vmatprep.subr.bf16.mxu0 %v1370_v39  ;;  %1267 = vmatprep.subr.bf16.mxu1 %v1371_v40 }
  0x47   : > { %1246 = vmatpush3.bf16.msra.mxu0 %v1372_v41  ;;  %1268 = vmatpush3.bf16.msra.mxu1 %v1373_v42  ;;  %v563_v41 = vld [vmem:[#allocation2] sm:$0xff] }
  0x48   : > { %1247 = vmatprep.subr.bf16.mxu0 %v1374_v43  ;;  %1269 = vmatprep.subr.bf16.mxu1 %v1375_v44 }
  0x4b   : > { %1248 = vmatpush3.bf16.msra.mxu0 %v1376_v45  ;;  %1270 = vmatpush3.bf16.msra.mxu1 %v1377_v46 }
  0x4c   : > { %1249 = vmatprep.subr.bf16.mxu0 %v1378_v47  ;;  %1271 = vmatprep.subr.bf16.mxu1 %v1379_v48 }
  0x4f   : > { %1250 = vmatpush3.bf16.msra.mxu0 %v1380_v49  ;;  %1272 = vmatpush3.bf16.msra.mxu1 %v1381_v50 }
  0xf2   : > { %v495_v60 = vpop.f32.mrf.mxu0  ;;  %v536_v61 = vpop.f32.mrf.mxu1 }
  0xf3   : > { %v496_v0 = vadd.f32 %v495_v60, %v400_v58  ;;  %v537_v1 = vadd.f32 %v536_v61, %v408_v59 }
  0xf4   : > { %v497_v2 = vpop.f32.mrf.mxu0  ;;  %v538_v3 = vpop.f32.mrf.mxu1 }
  0xf5   : > { %v547_v4 = vmul.f32 0.70710677, %v496_v0  ;;  %v549_v5 = vmul.f32 0.70710677, %v537_v1  ;;  %v498_v6 = vadd.f32 %v497_v2, %v404_v62  ;;  %v539_v7 = vadd.f32 %v538_v3, %v412_v63 }
  0xf6   : > { %v499_v8 = vpop.f32.mrf.mxu0  ;;  %v540_v9 = vpop.f32.mrf.mxu1  ;;  %v543_v19 = vmul.f32 0.5, %v496_v0  ;;  %v545_v21 = vmul.f32 0.5, %v537_v1 }
  0xf7   : > { %1382 = verf.f32 %v547_v4  ;;  %v548_v10 = vmul.f32 0.70710677, %v498_v6  ;;  %v550_v13 = vmul.f32 0.70710677, %v539_v7  ;;  %v544_v22 = vmul.f32 0.5, %v498_v6 }
  0xf8   : > { %1384 = verf.f32 %v549_v5  ;;  %v500_v11 = vpop.f32.mrf.mxu0  ;;  %v541_v12 = vpop.f32.mrf.mxu1  ;;  %v546_v25 = vmul.f32 0.5, %v539_v7 }
  0xf9   : > { %1386 = verf.f32 %v548_v10 }
  0xfa   : > { %1388 = verf.f32 %v550_v13 }
 0x104   : > { %v1383_v14 = vpop.eup %1382 }
 0x105   : > { %v1385_v15 = vpop.eup %1384  ;;  %v555_v16 = vadd.f32 1.0, %v1383_v14 }
 0x106   : > { %v557_v17 = vadd.f32 1.0, %v1385_v15  ;;  %v1387_v18 = vpop.eup %1386 }
 0x107   : > { %v1389_v20 = vpop.eup %1388  ;;  %v556_v23 = vadd.f32 1.0, %v1387_v18  ;;  %v559_v24 = vmul.f32 %v555_v16, %v543_v19 }
 0x108   : > { %v558_v26 = vadd.f32 1.0, %v1389_v20  ;;  %v561_v27 = vmul.f32 %v557_v17, %v545_v21 }
 0x109   : > { %v560_v28 = vmul.f32 %v556_v23, %v544_v22  ;;  %v564_v31 = vpack.c.bf16 %v559_v24, %v559_v24 }
 0x10a   : > { %v562_v29 = vmul.f32 %v558_v26, %v546_v25  ;;  %v566_v33 = vpack.c.bf16 %v561_v27, %v561_v27 }
 0x10b   : > { %v565_v30 = vpack.c.bf16 %v560_v28, %v560_v28 }
 0x10c   : > { %v567_v32 = vpack.c.bf16 %v562_v29, %v562_v29 }
 0x10d   : > { %856 = vmatprep.mubr.bf16.mxu0 %v565_v30 }
 0x10e   : > { %896 = vmatprep.mubr.bf16.mxu1 %v567_v32  ;;  %857 = vmatmul.mubr.bf16.vlgmr.msra.gmra.mxu0 %v564_v31 }
 0x10f   : > { %897 = vmatmul.mubr.bf16.vlgmr.msra.gmra.mxu1 %v566_v33 }
 0x1ce   : > { %v1251_v34 = vpop.f32.mrf.mxu0 }
 0x1cf   : > { %v1273_v35 = vpop.f32.mrf.mxu1 }
 0x1d0   : > { %v1252_v36 = vpop.f32.mrf.mxu0 }
 0x1d1   : > { %v1253_v37 = vadd.f32 %v1252_v36, %v1251_v34  ;;  %v1274_v38 = vpop.f32.mrf.mxu1 }
 0x1d2   : > { %v1275_v39 = vadd.f32 %v1274_v38, %v1273_v35  ;;  %v1254_v40 = vpop.f32.mrf.mxu0 }
 0x1d3   : > { %v1276_v42 = vpop.f32.mrf.mxu1 }
 0x1d4   : > { %v899_v43 = vadd.f32 %v1275_v39, %v1253_v37  ;;  %v1255_v44 = vpop.f32.mrf.mxu0  ;;  %909 = sbr.rel (%p1226_p12) target bundleno = 657 (0x291), region = 75 }
 0x1d5   : > { %v1277_v45 = vpop.f32.mrf.mxu1 }
 0x1d6   : > { %v904_v46 = vadd.f32 %v899_v43, %v563_v41 }
 0x1d8   : > { %905 = vst.msk [vmem:[#allocation2] sm:$0xff] %vm457_vm1, %v904_v46 }
 0x1d9   : > { %v1227_v48 = vld [vmem:[%s1757_s4] ss:$0 sm:$0xff]  ;;  %v1658_v49 = vand.u32 127, %v397_v51  ;;  %v923_v12 = vld [vmem:[%s1758_s5 + $0x4] sm:$0x7]  ;;  %v1494_v13 = vmov 3.0  }
 0x1da   : > { %v922_v5 = vld [vmem:[%s1758_s5] sm:$0x7]  ;;  %v924_v15 = vld [vmem:[%s1758_s5 + $0x8] sm:$0x7]  ;;  %v988_v18 = vrot.slane %v923_v12, %v1647_v56  ;;  %v993_v19 = vrot.slane %v923_v12, %v1640_v54  ;;  %v983_v24 = vrot.slane %v923_v12, %v1638_v53 }
 0x1db   : > { %vm926_vm2 = vcmp.lt.s32.totalorder %v1658_v49, 8  ;;  %vm962_vm3 = vcmp.ge.s32.totalorder %v1658_v49, 8  ;;  %vm963_vm4 = vcmp.lt.s32.totalorder %v1658_v49, 16  ;;  %vm1001_vm5 = vcmp.ge.s32.totalorder %v1658_v49, 16 }
 0x1dc   : > { %vm964_vm6 = vmand %vm962_vm3, %vm963_vm4  ;;  %vm1002_vm7 = vcmp.lt.s32.totalorder %v1658_v49, 32  ;;  %v950_v7 = vrot.slane %v922_v5, %v1647_v56  ;;  %v955_v8 = vrot.slane %v922_v5, %v1640_v54  ;;  %v945_v10 = vrot.slane %v922_v5, %v1638_v53 }
 0x1dd   : > { %vm1003_vm8 = vmand %vm1001_vm5, %vm1002_vm7  ;;  %v1027_v25 = vrot.slane %v924_v15, %v1647_v56  ;;  %v1032_v26 = vrot.slane %v924_v15, %v1640_v54  ;;  %v1022_v29 = vrot.slane %v924_v15, %v1638_v53 }
 0x1df   : > { %v910_v47 = vld [vmem:[#allocation2] sm:$0xff] }
 0x1e0   : > { %v918_v50 = vadd.f32 %v1227_v48, %v910_v47 }
 0x1e2   : > { %v919_v52 = vmul.f32 %v918_v50, %v918_v50 }
 0x1e4   : > { %v930_v51 = vsel %vm926_vm2, %v919_v52, 0.0  ;;  %v967_v55 = vsel %vm964_vm6, %v919_v52, 0.0  ;;  %v1006_v57 = vsel %vm1003_vm8, %v919_v52, 0.0 }
 0x1e5   : > { %v931_v58 = vsel %vm457_vm1, %v930_v51, 0.0  ;;  %v1007_v59 = vsel %vm457_vm1, %v1006_v57, 0.0  ;;  %v968_v60 = vsel %vm457_vm1, %v967_v55, 0.0 }
 0x1e6   : > { %932 = vadd.xlane.f32.xlu0 %v931_v58  ;;  %1008 = vadd.xlane.f32.xlu1 %v1007_v59 }
 0x1ea   : > { %969 = vadd.xlane.f32.xlu0 %v968_v60 }
 0x26f   : > { %v933_v61 = vpop.xlane.xlu0 %932  ;;  %v1009_v0 = vpop.xlane.xlu1 %1008 }
 0x270   : > { %v935_v62 = vmax.f32 %v933_v61, 1e-24 }
 0x272   : > { %1390 = vrsqrt.f32 %v935_v62 }
 0x273   : > { %v970_v63 = vpop.xlane.xlu0 %969 }
 0x274   : > { %v971_v1 = vadd.f32 %v970_v63, %v933_v61 }
 0x276   : > { %v972_v2 = vmax.f32 %v971_v1, 1e-24  ;;  %v1010_v3 = vadd.f32 %v1009_v0, %v971_v1 }
 0x278   : > { %1392 = vrsqrt.f32 %v972_v2  ;;  %v1011_v4 = vmax.f32 %v1010_v3, 1e-24 }
 0x27a   : > { %1394 = vrsqrt.f32 %v1011_v4 }
 0x27f   : > { %v1391_v6 = vpop.eup %1390 }
 0x280   : > { %v937_v9 = vmul.f32 %v1391_v6, %v918_v50 }
 0x282   : > { %v940_v11 = vsel %vm926_vm2, %v937_v9, 0.0 }
 0x283   : > { %941 = vst.msk [vmem:[#allocation4] sm:$0xff] %vm457_vm1, %v940_v11  ;;  %vm951_vm9 = vcmp.le.f32.partialorder %v940_v11, %v950_v7  ;;  %vm956_vm10 = vcmp.le.f32.partialorder %v940_v11, %v955_v8  ;;  %vm946_vm11 = vcmp.le.f32.partialorder %v940_v11, %v945_v10 }
 0x284   : > { %v957_v14 = vsel %vm956_vm10, 2.0, %v1494_v13 }
 0x285   : > { %v1393_v16 = vpop.eup %1392  ;;  %v958_v17 = vsel %vm951_vm9, 1.0, %v957_v14 }
 0x286   : > { %v959_v20 = vsel %vm946_vm11, 0.0, %v958_v17  ;;  %v974_v21 = vmul.f32 %v1393_v16, %v918_v50 }
 0x287   : > { %v1395_v22 = vpop.eup %1394  ;;  %v960_v23 = vsel %vm926_vm2, %v959_v20, 0.0 }
 0x288   : > { %961 = vst.msk [vmem:[#allocation6] sm:$0xff] %vm457_vm1, %v960_v23  ;;  %v977_v27 = vsel %vm963_vm4, %v974_v21, 0.0  ;;  %v1013_v28 = vmul.f32 %v1395_v22, %v918_v50 }
 0x289   : > { %979 = vst.msk [vmem:[#allocation4 + $0x8] sm:$0xff] %vm457_vm1, %v977_v27  ;;  %vm989_vm12 = vcmp.le.f32.partialorder %v977_v27, %v988_v18  ;;  %vm994_vm13 = vcmp.le.f32.partialorder %v977_v27, %v993_v19  ;;  %vm984_vm14 = vcmp.le.f32.partialorder %v977_v27, %v983_v24 }
 0x28a   : > { %v995_v30 = vsel %vm994_vm13, 2.0, %v1494_v13  ;;  %v1016_v31 = vsel %vm1002_vm7, %v1013_v28, 0.0 }
 0x28b   : > { %v996_v56 = vsel %vm989_vm12, 1.0, %v995_v30  ;;  %1018 = vst.msk [vmem:[#allocation4 + $0x10] sm:$0xff] %vm457_vm1, %v1016_v31  ;;  %vm1028_vm15 = vcmp.le.f32.partialorder %v1016_v31, %v1027_v25  ;;  %vm1033_vm0 = vcmp.le.f32.partialorder %v1016_v31, %v1032_v26  ;;  %vm1023_vm2 = vcmp.le.f32.partialorder %v1016_v31, %v1022_v29 }
 0x28c   : > { %v997_v54 = vsel %vm984_vm14, 0.0, %v996_v56  ;;  %v1034_v32 = vsel %vm1033_vm0, 2.0, %v1494_v13 }
 0x28d   : > { %v998_v33 = vsel %vm963_vm4, %v997_v54, 0.0  ;;  %v1035_v34 = vsel %vm1028_vm15, 1.0, %v1034_v32 }
 0x28e   : > { %1000 = vst.msk [vmem:[#allocation6 + $0x8] sm:$0xff] %vm457_vm1, %v998_v33  ;;  %v1036_v53 = vsel %vm1023_vm2, 0.0, %v1035_v34 }
 0x28f   : > { %v1037_v35 = vsel %vm1002_vm7, %v1036_v53, 0.0 }
 0x290   : > { %1039 = vst.msk [vmem:[#allocation6 + $0x10] sm:$0xff] %vm457_vm1, %v1037_v35 }
 0x291 PF: > { %p1712_p13 = scmp.eq.s32.totalorder %s1171_s29, 1  ;;  %s1495_s11 = smov [#allocation4]  }
 0x292   : > { %s1048_s12 = sshll.u32 %s1495_s11, 4  ;;  %s1049_s12 = int_to_ptr.vmem [resolvable:$true] %s1048_s12 }
 0x293   : > { %s1396_s13 = scalar_lea.vmem %s1049_s12, 384  ;;  %p1403_p3 = scmp.lt.s32.totalorder %s1049_s12, %s1049_s12 }
 0x294   : > { %p1397_p0 = scmp.ne.s32.totalorder %s1049_s12, %s1396_s13  ;;  %p1404_p4 = scmp.lt.s32.totalorder %s1396_s13, %s1396_s13 }
 0x296   : > { %p1398_p1 = pnand %p1397_p0, %p1712_p13  ;;  %p1405_p5 = por %p1404_p4, %p1403_p3 }
 0x298   : > { %p1399_p2 = pneg %p1398_p1 }
 0x29a   : > { %p1406_p6 = pnand %p1405_p5, %p1399_p2 }
 0x29c   : > { %1409 = shalt.err (!%p1406_p6)
}
 0x29d   : > { %s1496_s24 = smov 128   ;;  %s1497_s29 = smov 8  }
 0x29e   : > { %1280 = dma.vmem_to_hbm [thread:$0]  (%p1712_p13), %s1049_s12, 384, %s1759_s6, [#allocation5], %s1496_s24, %s1496_s24, %s1497_s29  }
 0x29f   : > { %s1498_s16 = smov [#allocation6]  }
 0x2a0   : > { %s1063_s17 = sshll.u32 %s1498_s16, 4  ;;  %s1064_s17 = int_to_ptr.vmem [resolvable:$true] %s1063_s17 }
 0x2a1   : > { %s1420_s18 = scalar_lea.vmem %s1064_s17, 384  ;;  %p1427_p10 = scmp.lt.s32.totalorder %s1064_s17, %s1064_s17 }
 0x2a2   : > { %p1421_p7 = scmp.ne.s32.totalorder %s1064_s17, %s1420_s18  ;;  %p1428_p11 = scmp.lt.s32.totalorder %s1420_s18, %s1420_s18 }
 0x2a4   : > { %p1422_p8 = pnand %p1421_p7, %p1712_p13  ;;  %p1429_p12 = por %p1428_p11, %p1427_p10 }
 0x2a6   : > { %p1423_p9 = pneg %p1422_p8 }
 0x2a8   : > { %p1430_p0 = pnand %p1429_p12, %p1423_p9 }
 0x2aa   : > { %1433 = shalt.err (!%p1430_p0)
}
 0x2ab   : > { %1282 = dma.vmem_to_hbm [thread:$0]  (%p1712_p13), %s1064_s17, 384, %s1760_s7, [#allocation7], %s1496_s24, %s1496_s24, %s1497_s29  }
 0x2ac   : > { %1465 = dma.done.wait (%p1712_p13), [#allocation5], 384  }
 0x2ad   : > { %1467 = vsyncadd (%p1712_p13), [#allocation5], 4294966912 }
 0x2ae   : > { %1469 = dma.done.wait (%p1712_p13), [#allocation7], 384  }
 0x2af   : > { %1471 = vsyncadd (%p1712_p13), [#allocation7], 4294966912 }
 0x2b0 PF: > { %s20_s28 = sadd.s32 1, %s1490_s28   ;;  %s1762_s24 = smov %s1478_s25 }
 0x2b1   : > { %p17_p1 = scmp.ge.s32.totalorder %s20_s28, 4   ;;  %s1763_s25 = smov %s1575_s10 }
 0x2b2   : > { %s1764_s26 = smov %s1486_s27  ;;  %s1765_s27 = smov %s1767_s30 }
 0x2b3   :  { %19 = sbr.rel (!%p17_p1) target bundleno = 4 (0x4), region = 130 }
 0x2b8   :  { %1083 = vsyncpa [#allocation5], 1 }
 0x2b9   :  { %1085 = vsyncpa [#allocation5 + $0x1], 1 }
 0x2ba   :  { %1086 = vsyncpa [#allocation7], 1 }

</bundles_post_ra>
